<compile_context>
chip_gen: v6e
topology: v6e:2x2x1
jax: 0.10.0
libtpu: 0.0.40
codegen_flags: <defaults>
</compile_context>

<pallas_src>
import jax
import jax.numpy as jnp
from jax.experimental import pallas as pl
from jax.experimental.pallas import tpu as pltpu


def _round_up(x, m):
    return ((x + m - 1) // m) * m


def _modulation_kernel(x_ref, w_ref, b_ref, o_ref):
    # SiLU in f32 (sigmoid goes to the EUP slot), then bf16 MXU matmul with
    # f32 accumulation, bias add in f32, cast on store.
    x = x_ref[...].astype(jnp.float32)
    xs = x * jax.nn.sigmoid(x)
    y = jnp.dot(xs.astype(jnp.bfloat16), w_ref[...],
                preferred_element_type=jnp.float32)
    y = y + b_ref[...]                      # b_ref is (1, Np) f32, broadcasts
    o_ref[...] = y.astype(o_ref.dtype)


def modulation_pallas(vec, w, b, *, double, tm=256):
    """Modulation forward.

    vec: (B, dim)
    w:   (dim, multiplier*dim)   -- (in_features, out_features) layout, i.e.
                                    the transpose of torch's nn.Linear.weight
    b:   (multiplier*dim,)
    Returns a tuple of `multiplier` arrays of shape (B, 1, dim), matching
    `lin(silu(vec))[:, None, :].chunk(multiplier, dim=-1)`.
    """
    B, dim = vec.shape
    mult = 6 if double else 3
    out_dim = mult * dim
    assert w.shape == (dim, out_dim)
    assert b.shape == (out_dim,)

    # Lane-dense padding of the contraction (K) and output (N) dims, row
    # padding to the tile (so any batch size works, no divisibility assert).
    Kp = _round_up(dim, 128)
    Np = _round_up(out_dim, 128)
    tm = max(8, min(tm, _round_up(B, 8)))   # don't blow up tiny batches
    Mp = _round_up(B, tm)

    x_p = jnp.zeros((Mp, Kp), vec.dtype).at[:B, :dim].set(vec)
    w_p = jnp.zeros((Kp, Np), jnp.bfloat16).at[:dim, :out_dim].set(
        w.astype(jnp.bfloat16))
    b_p = jnp.zeros((1, Np), jnp.float32).at[:, :out_dim].set(
        b.astype(jnp.float32))

    cost = pl.CostEstimate(
        flops=2 * Mp * Kp * Np,
        transcendentals=Mp * Kp,                       # sigmoid
        bytes_accessed=(Mp * Kp * vec.dtype.itemsize   # x in
                        + Kp * Np * 2                  # bf16 weights
                        + Np * 4                       # bias
                        + Mp * Np * vec.dtype.itemsize))  # out

    out = pl.pallas_call(
        _modulation_kernel,
        out_shape=jax.ShapeDtypeStruct((Mp, Np), vec.dtype),
        grid_spec=pltpu.PrefetchScalarGridSpec(
            num_scalar_prefetch=0,
            grid=(Mp // tm,),
            in_specs=[
                pl.BlockSpec((tm, Kp), lambda i: (i, 0)),   # activations
                pl.BlockSpec((Kp, Np), lambda i: (0, 0)),   # weight (resident)
                pl.BlockSpec((1, Np), lambda i: (0, 0)),    # bias (resident)
            ],
            out_specs=pl.BlockSpec((tm, Np), lambda i: (i, 0)),
        ),
        compiler_params=pltpu.CompilerParams(
            dimension_semantics=("parallel",)),
        cost_estimate=cost,
    )(x_p, w_p, b_p)

    y = out[:B, :out_dim]
    # [:, None, :].chunk(multiplier, dim=-1) -> tuple of (B, 1, dim)
    return tuple(y[:, None, k * dim:(k + 1) * dim] for k in range(mult))


def modulation_ref(vec, w, b, *, double):
    """Plain-JAX reference with identical numerics (bf16 MXU operands,
    f32 accumulation) for verification."""
    mult = 6 if double else 3
    dim = vec.shape[-1]
    x = vec.astype(jnp.float32)
    xs = x * jax.nn.sigmoid(x)
    y = jnp.dot(xs.astype(jnp.bfloat16), w.astype(jnp.bfloat16),
                preferred_element_type=jnp.float32) + b.astype(jnp.float32)
    y = y.astype(vec.dtype)
    return tuple(y[:, None, k * dim:(k + 1) * dim] for k in range(mult))


if __name__ == "__main__":
    key = jax.random.PRNGKey(0)
    dim = 128
    batch = 2
    double = True
    mult = 6 if double else 3

    k1, k2, k3 = jax.random.split(key, 3)
    vec = jax.random.normal(k1, (batch, dim), jnp.float32)
    w = (jax.random.normal(k2, (dim, mult * dim)) * 0.05).astype(jnp.float32)
    b = (jax.random.normal(k3, (mult * dim,)) * 0.05).astype(jnp.float32)

    outs = modulation_pallas(vec, w, b, double=double)
    outs = jax.block_until_ready(outs)

    outs_ref = modulation_ref(vec, w, b, double=double)
    assert len(outs) == mult
    for o, r in zip(outs, outs_ref):
        assert o.shape == (batch, 1, dim)
        assert jnp.allclose(o, r, atol=1e-4, rtol=1e-4), "mismatch vs reference"

    print("KERNEL_OK")
</pallas_src>

<mosaic_0001>
module attributes {stable_mosaic.version = 11 : i64} {
  func.func @_modulation_kernel(%arg0: i32, %arg1: memref<8x128xf32, #tpu.memory_space<vmem>>, %arg2: memref<128x768xbf16, #tpu.memory_space<vmem>>, %arg3: memref<1x768xf32, #tpu.memory_space<vmem>>, %arg4: memref<8x768xf32, #tpu.memory_space<vmem>>) attributes {dimension_semantics = [#tpu.dimension_semantics<parallel>], iteration_bounds = array<i64: 1>, scalar_prefetch = 0 : i64, scratch_operands = 0 : i64, tpu.core_type = #tpu.core_type<tc>, window_params = [{transform_indices = @transform_0, window_bounds = array<i64: 8, 128>}, {pipeline_mode = #tpu.pipeline_mode<synchronous>, transform_indices = @transform_1, window_bounds = array<i64: 128, 768>}, {pipeline_mode = #tpu.pipeline_mode<synchronous>, transform_indices = @transform_2, window_bounds = array<i64: 1, 768>}, {transform_indices = @transform_3, window_bounds = array<i64: 8, 768>}]} {
    %c0 = arith.constant 0 : index
    %c0_0 = arith.constant 0 : index
    %0 = vector.load %arg1[%c0, %c0_0] : memref<8x128xf32, #tpu.memory_space<vmem>>, vector<8x128xf32>
    %1 = arith.negf %0 : vector<8x128xf32>
    %2 = math.exp %1 : vector<8x128xf32>
    %cst = arith.constant 1.000000e+00 : f32
    %3 = vector.broadcast %cst : f32 to vector<8x128xf32>
    %4 = arith.addf %3, %2 : vector<8x128xf32>
    %5 = arith.divf %3, %4 : vector<8x128xf32>
    %6 = arith.mulf %0, %5 : vector<8x128xf32>
    %7 = arith.truncf %6 : vector<8x128xf32> to vector<8x128xbf16>
    %c0_1 = arith.constant 0 : index
    %c0_2 = arith.constant 0 : index
    %8 = vector.load %arg2[%c0_1, %c0_2] : memref<128x768xbf16, #tpu.memory_space<vmem>>, vector<128x768xbf16>
    %cst_3 = arith.constant dense<0.000000e+00> : vector<8x768xf32>
    %9 = tpu.matmul %7, %8, %cst_3 {dimension_numbers = #tpu.dot_dimension_numbers<[1], [0], [0], [1], [0, 0, 1, 1], [], []>} : vector<8x128xbf16>, vector<128x768xbf16>, vector<8x768xf32> -> vector<8x768xf32>
    %c0_4 = arith.constant 0 : index
    %c0_5 = arith.constant 0 : index
    %10 = vector.load %arg3[%c0_4, %c0_5] : memref<1x768xf32, #tpu.memory_space<vmem>>, vector<1x768xf32>
    %11 = vector.broadcast %10 : vector<1x768xf32> to vector<8x768xf32>
    %12 = arith.addf %9, %11 : vector<8x768xf32>
    %c0_6 = arith.constant 0 : index
    %c0_7 = arith.constant 0 : index
    %13 = vector.load %arg4[%c0_6, %c0_7] : memref<8x768xf32, #tpu.memory_space<vmem>>, vector<8x768xf32>
    tpu.vector_store %arg4[%c0_6, %c0_7], %12 {strides = array<i32>} : memref<8x768xf32, #tpu.memory_space<vmem>>, vector<8x768xf32>,
    return
  }
  func.func @transform_0(%arg0: i32) -> (i32, i32) {
    %c0_i32 = arith.constant 0 : i32
    %c0_i32_0 = arith.constant 0 : i32
    return %arg0, %c0_i32 : i32, i32
  }
  func.func @transform_1(%arg0: i32) -> (i32, i32) {
    %c0_i32 = arith.constant 0 : i32
    %c0_i32_0 = arith.constant 0 : i32
    %c0_i32_1 = arith.constant 0 : i32
    return %c0_i32, %c0_i32_0 : i32, i32
  }
  func.func @transform_2(%arg0: i32) -> (i32, i32) {
    %c0_i32 = arith.constant 0 : i32
    %c0_i32_0 = arith.constant 0 : i32
    %c0_i32_1 = arith.constant 0 : i32
    return %c0_i32, %c0_i32_0 : i32, i32
  }
  func.func @transform_3(%arg0: i32) -> (i32, i32) {
    %c0_i32 = arith.constant 0 : i32
    %c0_i32_0 = arith.constant 0 : i32
    return %arg0, %c0_i32 : i32, i32
  }
}

</mosaic_0001>

<bundles_post_ra>
// kernel: tpu_custom_call.1
= control target key start
LH: loop header
LB: loop body
LE: loop exit
PB: predicated region body
PF: predicated region fallthrough
CT: control target
= control target key end

     0   :  { %8 = vsyncpa [#allocation3], 0  ;;  %s787_s0 = inlined_call_operand.hbm [shape: f32[8,128], index: 0, kind: input, shape index: {}]   ;;  %s788_s1 = inlined_call_operand.hbm [shape: bf16[128,768], index: 1, kind: input, shape index: {}]   ;;  %s789_s2 = inlined_call_operand.hbm [shape: f32[1,768], index: 2, kind: input, shape index: {}]   ;;  %s790_s3 = inlined_call_operand.hbm [shape: f32[8,768], index: 3, kind: output, shape index: {}]  }
   0x1   :  { %9 = vsyncpa [#allocation6], 0 }
   0x2   :  { %10 = vsyncpa [#allocation4], 0  ;;  %s745_s12 = smov [#allocation5]  }
   0x3   :  { %s26_s13 = sshll.u32 %s745_s12, 4  ;;  %s27_s13 = int_to_ptr.vmem [resolvable:$true] %s26_s13 }
   0x4   :  { %s667_s14 = scalar_lea.vmem %s27_s13, 6144  ;;  %p672_p1 = scmp.lt.s32.totalorder %s27_s13, %s27_s13 }
   0x5   :  { %p668_p0 = scmp.ne.s32.totalorder %s27_s13, %s667_s14  ;;  %p673_p2 = scmp.lt.s32.totalorder %s667_s14, %s667_s14 }
   0x7   :  { %p674_p3 = por %p673_p2, %p672_p1 }
   0x9   :  { %p675_p4 = pnand %p674_p3, %p668_p0 }
   0xb   :  { %678 = shalt.err (!%p675_p4)
}
   0xc   :  { %s746_s15 = smov 384   ;;  %s747_s16 = smov 24  }
   0xd   :  { %32 = dma.hbm_to_vmem [thread:$0]  %s788_s1, 6144, %s27_s13, [#allocation6], %s746_s15, %s746_s15, %s747_s16  }
   0xe   :  { %s748_s19 = smov [#allocation2]   ;;  %s749_s21 = smov [#allocation7]  }
   0xf   :  { %s17_s20 = sshll.u32 %s748_s19, 4  ;;  %s39_s22 = sshll.u32 %s749_s21, 4  ;;  %s18_s20 = int_to_ptr.vmem [resolvable:$true] %s17_s20  ;;  %s40_s22 = int_to_ptr.vmem [resolvable:$true] %s39_s22 }
  0x10   :  { %s687_s23 = scalar_lea.vmem %s18_s20, 128  ;;  %p692_p6 = scmp.lt.s32.totalorder %s18_s20, %s18_s20 }
  0x11   :  { %p688_p5 = scmp.ne.s32.totalorder %s18_s20, %s687_s23  ;;  %p693_p7 = scmp.lt.s32.totalorder %s687_s23, %s687_s23 }
  0x13   :  { %p694_p8 = por %p693_p7, %p692_p6 }
  0x15   :  { %p695_p9 = pnand %p694_p8, %p688_p5 }
  0x17   :  { %698 = shalt.err (!%p695_p9)
}
  0x18   :  { %20 = dma.hbm_to_vmem [thread:$0]  %s787_s0, 128, %s18_s20, [#allocation3]  }
  0x19   :  { %s707_s26 = scalar_lea.vmem %s40_s22, 96  ;;  %p712_p11 = scmp.lt.s32.totalorder %s40_s22, %s40_s22 }
  0x1a   :  { %p708_p10 = scmp.ne.s32.totalorder %s40_s22, %s707_s26  ;;  %p713_p12 = scmp.lt.s32.totalorder %s707_s26, %s707_s26 }
  0x1c   :  { %p714_p13 = por %p713_p12, %p712_p11 }
  0x1e   :  { %p715_p0 = pnand %p714_p13, %p708_p10 }
  0x20   :  { %718 = shalt.err (!%p715_p0)
}
  0x21   :  { %42 = dma.hbm_to_vmem [thread:$0]  %s789_s2, 96, %s40_s22, [#allocation6]  }
  0x22   :  { %739 = dma.done.wait [#allocation3], 128  }
  0x23   :  { %740 = vsyncadd [#allocation3], 4294967168 }
  0x24   :  { %741 = dma.done.wait [#allocation6], 6240  }
  0x25   :  { %742 = vsyncadd [#allocation6], 4294961056  ;;  %v750_v0 = vmov 0   ;;  %v583_v1 = vld [vmem:[#allocation5 + $0x154] ss:$24 sps:$4 sm:$0xff]   ;;  %v53_v15 = vld [vmem:[#allocation2] sm:$0xff]  ;;  %v112_v56 = vlaneseq }
  0x26   :  { %414 = vmatprep.mubr.bf16.mxu0 %v750_v0  ;;  %455 = vmatprep.mubr.bf16.mxu1 %v750_v0  ;;  %v585_v2 = vld [vmem:[#allocation5 + $0x150] ss:$24 sps:$4 sm:$0xff]   ;;  %v586_v3 = vld [vmem:[#allocation5 + $0x124] ss:$24 sps:$4 sm:$0xff]   ;;  %v588_v4 = vld [vmem:[#allocation5 + $0x120] ss:$24 sps:$4 sm:$0xff]  }
  0x27   :  { %382 = vmatprep.subr.bf16.mxu0 %v583_v1  ;;  %v589_v5 = vld [vmem:[#allocation5 + $0xf4] ss:$24 sps:$4 sm:$0xff]   ;;  %v591_v6 = vld [vmem:[#allocation5 + $0xf0] ss:$24 sps:$4 sm:$0xff]   ;;  %v592_v7 = vld [vmem:[#allocation5 + $0xc4] ss:$24 sps:$4 sm:$0xff]  }
  0x28   :  { %383 = vmatpush1.bf16.msra.mxu0 %v585_v2  ;;  %v604_v8 = vld [vmem:[#allocation5 + $0x15c] ss:$24 sps:$4 sm:$0xff]   ;;  %v606_v9 = vld [vmem:[#allocation5 + $0x158] ss:$24 sps:$4 sm:$0xff]   ;;  %v610_v12 = vld [vmem:[#allocation5 + $0x12c] ss:$24 sps:$4 sm:$0xff]  }
  0x29   :  { %384 = vmatprep.subr.bf16.mxu0 %v586_v3  ;;  %v594_v10 = vld [vmem:[#allocation5 + $0xc0] ss:$24 sps:$4 sm:$0xff]   ;;  %v595_v11 = vld [vmem:[#allocation5 + $0x94] ss:$24 sps:$4 sm:$0xff]   ;;  %423 = vmatprep.subr.bf16.mxu1 %v604_v8  ;;  %v597_v14 = vld [vmem:[#allocation5 + $0x90] ss:$24 sps:$4 sm:$0xff]  }
  0x2a   :  { %424 = vmatpush1.bf16.msra.mxu1 %v606_v9  ;;  %v612_v13 = vld [vmem:[#allocation5 + $0x128] ss:$24 sps:$4 sm:$0xff]   ;;  %v527_v16 = vmul.f32 -1.442695, %v53_v15  ;;  %v616_v17 = vld [vmem:[#allocation5 + $0xfc] ss:$24 sps:$4 sm:$0xff]  }
  0x2b   :  { %425 = vmatprep.subr.bf16.mxu1 %v610_v12  ;;  %v598_v18 = vld [vmem:[#allocation5 + $0x64] ss:$24 sps:$4 sm:$0xff]   ;;  %v618_v19 = vld [vmem:[#allocation5 + $0xf8] ss:$24 sps:$4 sm:$0xff]   ;;  %v601_v22 = vld [vmem:[#allocation5 + $0x34] ss:$24 sps:$4 sm:$0xff]  }
  0x2c   :  { %385 = vmatpush1.bf16.msra.mxu0 %v588_v4  ;;  %655 = vpow2.f32 %v527_v16  ;;  %v622_v20 = vld [vmem:[#allocation5 + $0xcc] ss:$24 sps:$4 sm:$0xff]   ;;  %v600_v21 = vld [vmem:[#allocation5 + $0x60] ss:$24 sps:$4 sm:$0xff]   ;;  %v628_v24 = vld [vmem:[#allocation5 + $0x9c] ss:$24 sps:$4 sm:$0xff]  }
  0x2d   :  { %386 = vmatprep.subr.bf16.mxu0 %v589_v5  ;;  %v624_v23 = vld [vmem:[#allocation5 + $0xc8] ss:$24 sps:$4 sm:$0xff]   ;;  %v607_v26 = vld [vmem:[#allocation5 + $0x4] ss:$24 sps:$4 sm:$0xff]   ;;  %v630_v27 = vld [vmem:[#allocation5 + $0x98] ss:$24 sps:$4 sm:$0xff]  }
  0x2e   :  { %426 = vmatpush1.bf16.msra.mxu1 %v612_v13  ;;  %v603_v25 = vld [vmem:[#allocation5 + $0x30] ss:$24 sps:$4 sm:$0xff]   ;;  %v634_v28 = vld [vmem:[#allocation5 + $0x6c] ss:$24 sps:$4 sm:$0xff]   ;;  %v609_v29 = vld [vmem:[#allocation5] ss:$24 sps:$4 sm:$0xff]  }
  0x2f   :  { %427 = vmatprep.subr.bf16.mxu1 %v616_v17  ;;  %v615_v30 = vld [vmem:[#allocation5 + $0x164] ss:$24 sps:$4 sm:$0xff]   ;;  %v636_v31 = vld [vmem:[#allocation5 + $0x68] ss:$24 sps:$4 sm:$0xff]   ;;  %v642_v35 = vld [vmem:[#allocation5 + $0x38] ss:$24 sps:$4 sm:$0xff]  }
  0x30   :  { %387 = vmatpush1.bf16.msra.mxu0 %v591_v6  ;;  %v640_v33 = vld [vmem:[#allocation5 + $0x3c] ss:$24 sps:$4 sm:$0xff]   ;;  %v646_v36 = vld [vmem:[#allocation5 + $0xc] ss:$24 sps:$4 sm:$0xff]   ;;  %v648_v37 = vld [vmem:[#allocation5 + $0x8] ss:$24 sps:$4 sm:$0xff]  }
  0x31   :  { %388 = vmatprep.subr.bf16.mxu0 %v592_v7  ;;  %v613_v40 = vld [vmem:[#allocation5 + $0x160] ss:$24 sps:$4 sm:$0xff]   ;;  %v621_v42 = vld [vmem:[#allocation5 + $0x134] ss:$24 sps:$4 sm:$0xff]   ;;  %v619_v43 = vld [vmem:[#allocation5 + $0x130] ss:$24 sps:$4 sm:$0xff]  }
  0x32   :  { %428 = vmatpush1.bf16.msra.mxu1 %v618_v19  ;;  %v627_v44 = vld [vmem:[#allocation5 + $0x104] ss:$24 sps:$4 sm:$0xff]   ;;  %v625_v45 = vld [vmem:[#allocation5 + $0x100] ss:$24 sps:$4 sm:$0xff]   ;;  %v633_v46 = vld [vmem:[#allocation5 + $0xd4] ss:$24 sps:$4 sm:$0xff]  }
  0x33   :  { %429 = vmatprep.subr.bf16.mxu1 %v622_v20  ;;  %v631_v47 = vld [vmem:[#allocation5 + $0xd0] ss:$24 sps:$4 sm:$0xff]   ;;  %v639_v48 = vld [vmem:[#allocation5 + $0xa4] ss:$24 sps:$4 sm:$0xff]   ;;  %v637_v49 = vld [vmem:[#allocation5 + $0xa0] ss:$24 sps:$4 sm:$0xff]  }
  0x34   :  { %389 = vmatpush1.bf16.msra.mxu0 %v594_v10  ;;  %v645_v50 = vld [vmem:[#allocation5 + $0x74] ss:$24 sps:$4 sm:$0xff]   ;;  %v643_v51 = vld [vmem:[#allocation5 + $0x70] ss:$24 sps:$4 sm:$0xff]   ;;  %v651_v52 = vld [vmem:[#allocation5 + $0x44] ss:$24 sps:$4 sm:$0xff]  }
  0x35   :  { %390 = vmatprep.subr.bf16.mxu0 %v595_v11  ;;  %v649_v53 = vld [vmem:[#allocation5 + $0x40] ss:$24 sps:$4 sm:$0xff]   ;;  %v654_v54 = vld [vmem:[#allocation5 + $0x14] ss:$24 sps:$4 sm:$0xff]   ;;  %v652_v55 = vld [vmem:[#allocation5 + $0x10] ss:$24 sps:$4 sm:$0xff]  }
  0x36   :  { %430 = vmatpush1.bf16.msra.mxu1 %v624_v23  ;;  %v113_v57 = vshrl.u32 %v112_v56, 7  ;;  %v110_v60 = vld [vmem:[#allocation7] sm:$0x3f]  ;;  %s751_s0 = smov [#allocation8]  }
  0x37   :  { %431 = vmatprep.subr.bf16.mxu1 %v628_v24  ;;  %s517_s2 = sshll.u32 %s751_s0, 4  ;;  %s518_s2 = int_to_ptr.vmem [resolvable:$true] %s517_s2 }
  0x38   :  { %391 = vmatpush1.bf16.msra.mxu0 %v597_v14  ;;  %v114_v58 = vsub.s32 0, %v113_v57  ;;  %v122_v59 = vsub.s32 2, %v113_v57  ;;  %v118_v61 = vsub.s32 1, %v113_v57  ;;  %v126_v62 = vsub.s32 3, %v113_v57  ;;  %s719_s28 = scalar_lea.vmem %s518_s2, 768  ;;  %p724_p2 = scmp.lt.s32.totalorder %s518_s2, %s518_s2 }
  0x39   :  { %392 = vmatprep.subr.bf16.mxu0 %v598_v18  ;;  %v656_v32 = vpop.eup %655  ;;  %v134_v16 = vsub.s32 5, %v113_v57  ;;  %p720_p1 = scmp.ne.s32.totalorder %s518_s2, %s719_s28  ;;  %p725_p3 = scmp.lt.s32.totalorder %s719_s28, %s719_s28 }
  0x3a   :  { %432 = vmatpush1.bf16.msra.mxu1 %v630_v27  ;;  %v57_v34 = vadd.f32 1.0, %v656_v32  ;;  %v115_v63 = vrot.slane %v110_v60, %v114_v58  ;;  %v119_v1 = vrot.slane %v110_v60, %v118_v61  ;;  %v127_v2 = vrot.slane %v110_v60, %v126_v62 }
  0x3b   :  { %433 = vmatprep.subr.bf16.mxu1 %v634_v28  ;;  %v135_v18 = vrot.slane %v110_v60, %v134_v16  ;;  %p726_p4 = por %p725_p3, %p724_p2 }
  0x3c   :  { %393 = vmatpush1.bf16.msra.mxu0 %v600_v21  ;;  %657 = vrcp.f32 %v57_v34 }
  0x3d   :  { %394 = vmatprep.subr.bf16.mxu0 %v601_v22  ;;  %p727_p5 = pnand %p726_p4, %p720_p1 }
  0x3e   :  { %434 = vmatpush1.bf16.msra.mxu1 %v636_v31 }
  0x3f   :  { %435 = vmatprep.subr.bf16.mxu1 %v640_v33 }
  0x40   :  { %395 = vmatpush1.bf16.msra.mxu0 %v603_v25 }
  0x41   :  { %396 = vmatprep.subr.bf16.mxu0 %v607_v26 }
  0x42   :  { %436 = vmatpush1.bf16.msra.mxu1 %v642_v35 }
  0x43   :  { %437 = vmatprep.subr.bf16.mxu1 %v646_v36 }
  0x44   :  { %397 = vmatpush1.bf16.msra.mxu0 %v609_v29 }
  0x45   :  { %464 = vmatprep.subr.bf16.mxu0 %v615_v30 }
  0x46   :  { %438 = vmatpush1.bf16.msra.mxu1 %v648_v37 }
  0x49   :  { %v658_v38 = vpop.eup %657 }
  0x4a   :  { %v60_v39 = vmul.f32 %v658_v38, %v53_v15  ;;  %v130_v15 = vsub.s32 4, %v113_v57 }
  0x4c   :  { %v61_v41 = vpack.c.bf16 %v60_v39, %v60_v39  ;;  %v131_v17 = vrot.slane %v110_v60, %v130_v15 }
  0x4e   :  { %415 = vmatmul.mubr.bf16.vlgmr.msra.gmra.mxu0 %v61_v41  ;;  %456 = vmatmul.mubr.bf16.vlgmr.msra.gmra.mxu1 %v61_v41 }
  0x4f   :  { %465 = vmatpush1.bf16.msra.mxu0 %v613_v40  ;;  %496 = vmatprep.mubr.bf16.mxu0 %v750_v0  ;;  %v123_v0 = vrot.slane %v110_v60, %v122_v59 }
  0x50   :  { %466 = vmatprep.subr.bf16.mxu0 %v621_v42 }
  0x53   :  { %467 = vmatpush1.bf16.msra.mxu0 %v619_v43 }
  0x54   :  { %468 = vmatprep.subr.bf16.mxu0 %v627_v44 }
  0x57   :  { %469 = vmatpush1.bf16.msra.mxu0 %v625_v45 }
  0x58   :  { %470 = vmatprep.subr.bf16.mxu0 %v633_v46 }
  0x5b   :  { %471 = vmatpush1.bf16.msra.mxu0 %v631_v47 }
  0x5c   :  { %472 = vmatprep.subr.bf16.mxu0 %v639_v48 }
  0x5f   :  { %473 = vmatpush1.bf16.msra.mxu0 %v637_v49 }
  0x60   :  { %474 = vmatprep.subr.bf16.mxu0 %v645_v50 }
  0x63   :  { %475 = vmatpush1.bf16.msra.mxu0 %v643_v51 }
  0x64   :  { %476 = vmatprep.subr.bf16.mxu0 %v651_v52 }
  0x67   :  { %477 = vmatpush1.bf16.msra.mxu0 %v649_v53 }
  0x68   :  { %478 = vmatprep.subr.bf16.mxu0 %v654_v54 }
  0x6b   :  { %479 = vmatpush1.bf16.msra.mxu0 %v652_v55 }
  0x6e   :  { %497 = vmatmul.mubr.bf16.vlgmr.msra.gmra.mxu0 %v61_v41 }
 0x10e   :  { %v416_v3 = vpop.f32.mrf.mxu0  ;;  %v457_v4 = vpop.f32.mrf.mxu1 }
 0x10f   :  { %v417_v5 = vadd.f32 %v416_v3, %v115_v63  ;;  %v458_v6 = vadd.f32 %v457_v4, %v123_v0 }
 0x110   :  { %v418_v7 = vpop.f32.mrf.mxu0  ;;  %v459_v8 = vpop.f32.mrf.mxu1 }
 0x111   :  { %505 = vst [vmem:[#allocation8] sm:$0xff] %v417_v5  ;;  %v419_v9 = vadd.f32 %v418_v7, %v119_v1  ;;  %507 = vst [vmem:[#allocation8 + $0x10] sm:$0xff] %v458_v6  ;;  %v460_v10 = vadd.f32 %v459_v8, %v127_v2 }
 0x112   :  { %v420_v11 = vpop.f32.mrf.mxu0  ;;  %v461_v12 = vpop.f32.mrf.mxu1 }
 0x113   :  { %506 = vst [vmem:[#allocation8 + $0x8] sm:$0xff] %v419_v9  ;;  %508 = vst [vmem:[#allocation8 + $0x18] sm:$0xff] %v460_v10 }
 0x114   :  { %v421_v13 = vpop.f32.mrf.mxu0  ;;  %v462_v14 = vpop.f32.mrf.mxu1 }
 0x12e   :  { %v498_v19 = vpop.f32.mrf.mxu0 }
 0x12f   :  { %v499_v20 = vadd.f32 %v498_v19, %v131_v17 }
 0x130   :  { %v500_v21 = vpop.f32.mrf.mxu0 }
 0x131   :  { %509 = vst [vmem:[#allocation8 + $0x20] sm:$0xff] %v499_v20  ;;  %v501_v22 = vadd.f32 %v500_v21, %v135_v18 }
 0x132   :  { %v502_v23 = vpop.f32.mrf.mxu0 }
 0x133   :  { %510 = vst [vmem:[#allocation8 + $0x28] sm:$0xff] %v501_v22 }
 0x134   :  { %v503_v24 = vpop.f32.mrf.mxu0 }
 0x135   :  { %730 = shalt.err (!%p727_p5)
}
 0x136   :  { %520 = dma.vmem_to_hbm [thread:$0]  %s518_s2, 768, %s790_s3, [#allocation4]  }
 0x137   :  { %743 = dma.done.wait [#allocation4], 768  }
 0x138   :  { %744 = vsyncadd [#allocation4], 4294966528 }
 0x139   :  { %524 = vsyncpa [#allocation3], 1 }
 0x13a   :  { %525 = vsyncpa [#allocation6], 1 }
 0x13b   :  { %526 = vsyncpa [#allocation4], 1 }

</bundles_post_ra>
